<compile_context>
chip_gen: v7x
topology: tpu7x:2x2x1
jax: 0.10.0
libtpu: 0.0.40
codegen_flags: <defaults>
</compile_context>

<pallas_src>
import functools

import jax
import jax.numpy as jnp
from jax import lax
from jax.experimental import pallas as pl
from jax.experimental.pallas import tpu as pltpu

QMAX = 127.0                        # INT8: 2**(8-1) - 1
_TARGET_BLOCK_ELEMS = 1024 * 1024   # ~4 MiB of f32 per block buffer
_MAX_LANE_TILE = 4096
_VMEM_LIMIT_BYTES = 32 * 1024 * 1024


# ---------------- Pallas kernels ----------------

def _minmax_kernel(x_ref, min_ref, max_ref, *, L, tl, col_steps, pw, masked):
    # Per-row lane-partial min/max of x, accumulated over the column (reduction) axis.
    j = pl.program_id(2)

    @pl.when(j == 0)
    def _():
        min_ref[...] = jnp.full(min_ref.shape, jnp.inf, dtype=jnp.float32)
        max_ref[...] = jnp.full(max_ref.shape, -jnp.inf, dtype=jnp.float32)

    x = x_ref[...].astype(jnp.float32)
    if masked:
        col0 = (pl.program_id(1) * col_steps + j) * tl
        ids = col0 + lax.broadcasted_iota(jnp.int32, x.shape, 1)
        valid = ids < L
        x_lo = jnp.where(valid, x, jnp.inf)
        x_hi = jnp.where(valid, x, -jnp.inf)
    else:
        x_lo = x_hi = x

    groups = tl // pw
    mn = x_lo[:, 0:pw]
    mx = x_hi[:, 0:pw]
    for g in range(1, groups):            # pure VPU elementwise combine (no XLU)
        s = slice(g * pw, (g + 1) * pw)
        mn = jnp.minimum(mn, x_lo[:, s])
        mx = jnp.maximum(mx, x_hi[:, s])
    min_ref[...] = jnp.minimum(min_ref[...], mn)
    max_ref[...] = jnp.maximum(max_ref[...], mx)


def _moments_kernel(inv_si_ref, x_ref, sum_ref, sq_ref, *, L, tl, col_steps, pw, masked):
    # Per-row lane-partial sums of the integer code q = round(clip(x/s_i)) and of q^2.
    j = pl.program_id(2)

    @pl.when(j == 0)
    def _():
        sum_ref[...] = jnp.zeros_like(sum_ref)
        sq_ref[...] = jnp.zeros_like(sq_ref)

    inv_s_i = inv_si_ref[0]
    x = x_ref[...].astype(jnp.float32)
    q = jnp.round(jnp.clip(x * inv_s_i, -QMAX, QMAX))
    if masked:
        col0 = (pl.program_id(1) * col_steps + j) * tl
        ids = col0 + lax.broadcasted_iota(jnp.int32, x.shape, 1)
        q = jnp.where(ids < L, q, 0.0)

    groups = tl // pw
    s1 = q[:, 0:pw]
    s2 = s1 * s1
    for g in range(1, groups):
        qg = q[:, g * pw:(g + 1) * pw]
        s1 = s1 + qg
        s2 = s2 + qg * qg
    sum_ref[...] += s1
    sq_ref[...] += s2


def _out_kernel(scal_ref, a2_ref, b2_ref, x_ref, o_ref):
    # Fused: q = round(clip(x/s_i)); out = s_o * round(clip(a2*q + b2)).
    # All scale factors are folded into the per-row affine (a2 = a*s_i/s_o, b2 = b/s_o).
    inv_s_i = scal_ref[0]
    s_o = scal_ref[1]
    x = x_ref[...].astype(jnp.float32)
    q = jnp.round(jnp.clip(x * inv_s_i, -QMAX, QMAX))
    y = a2_ref[...] * q + b2_ref[...]
    o_ref[...] = (s_o * jnp.round(jnp.clip(y, -QMAX, QMAX))).astype(o_ref.dtype)


# ---------------- tile selection ----------------

def _pick_tiles(R, L):
    # Lane (last-dim) tile: a multiple of 128.
    if L < 128:
        tl = L                                      # full extent (allowed)
    elif L % 128 == 0:
        tl = min(L, _MAX_LANE_TILE)
        while L % tl:
            tl -= 128
    else:
        # 128-aligned tiles + masked ragged tail (in-kernel mask / OOB-store masking).
        L_up = 128 * ((L + 127) // 128)
        tl = L_up if L_up <= _MAX_LANE_TILE else _MAX_LANE_TILE

    # Sublane (second-to-last) tile: multiple of 8, sized to a ~4 MiB f32 block.
    if R % 8 != 0:
        tr = R                                      # full-extent fallback
        # TODO(synk): pad/mask rows for R % 8 != 0 to get aligned sublane tiles.
    else:
        budget = max(8, (_TARGET_BLOCK_ELEMS // max(tl, 1)) // 8 * 8)
        tr = min(R, budget)
        while R % tr:
            tr -= 8
        # Keep >=2 row blocks when possible so the "parallel" row axis can be
        # sharded across the two v7x TensorCores.
        if tr == R and R >= 16:
            tr = max(8, (R // 2) // 8 * 8)
            while R % tr:
                tr -= 8
    return tr, tl


# ---------------- wrapper ----------------

def qbn_forward(x, gamma=None, beta=None, *, eps=1e-5,
                running_mean=None, running_var=None, use_batch_stats=True):
    N, C, H, W = x.shape
    R, L = N * C, H * W
    x2 = x.reshape(R, L)              # free reshape; row r -> channel r % C

    tr, tl = _pick_tiles(R, L)
    Rb = R // tr
    Ct = pl.cdiv(L, tl)
    masked = (L % tl) != 0
    # If the row axis has a single block, split columns into 2 "parallel" parts so
    # both TensorCores of a v7x chip get work (partials combined in the wrapper).
    P = 2 if (Rb == 1 and Ct >= 2 and Ct % 2 == 0) else 1
    Cs = Ct // P
    PW = min(128, tl)                 # lane-partial accumulator width

    grid_red = (Rb, P, Cs)
    red_semantics = ("parallel", "parallel", "arbitrary")
    x_spec_red = pl.BlockSpec((tr, tl), lambda i, p, j, Cs=Cs: (i, p * Cs + j))
    acc_spec = pl.BlockSpec((None, tr, PW), lambda i, p, j: (p, i, 0))
    acc_shape = jax.ShapeDtypeStruct((P, R, PW), jnp.float32)

    # ---- K1: tiled per-row min/max of x (qi calibration + per-channel extremes) ----
    minp, maxp = pl.pallas_call(
        functools.partial(_minmax_kernel, L=L, tl=tl, col_steps=Cs, pw=PW, masked=masked),
        out_shape=(acc_shape, acc_shape),
        grid=grid_red,
        in_specs=[x_spec_red],
        out_specs=(acc_spec, acc_spec),
        compiler_params=pltpu.CompilerParams(
            dimension_semantics=red_semantics,
            vmem_limit_bytes=_VMEM_LIMIT_BYTES),
    )(x2)
    row_min = jnp.min(minp, axis=(0, 2))          # (R,)  untouched lanes are +inf -> harmless
    row_max = jnp.max(maxp, axis=(0, 2))          # (R,)  untouched lanes are -inf -> harmless

    # ---- qi scale (QParam.update + calcScaleZeroPoint, first call, zp == 0) ----
    gmax = jnp.maximum(jnp.max(row_max), 0.0)
    gmin = jnp.minimum(jnp.min(row_min), 0.0)
    s_i = jnp.maximum(jnp.abs(gmax), jnp.abs(gmin)) / QMAX
    s_i = jnp.where(s_i == 0.0, 1.0, s_i)         # guard degenerate all-zero input
    inv_s_i = 1.0 / s_i

    if gamma is None:
        gamma = jnp.ones((C,), jnp.float32)
    if beta is None:
        beta = jnp.zeros((C,), jnp.float32)
    gamma = gamma.astype(jnp.float32)
    beta = beta.astype(jnp.float32)

    # ---- K2: per-row integer-code moments -> per-channel batch mean / biased var ----
    if use_batch_stats:
        sump, sqp = pl.pallas_call(
            functools.partial(_moments_kernel, L=L, tl=tl, col_steps=Cs, pw=PW, masked=masked),
            out_shape=(acc_shape, acc_shape),
            grid=grid_red,
            in_specs=[pl.BlockSpec(memory_space=pltpu.MemorySpace.SMEM), x_spec_red],
            out_specs=(acc_spec, acc_spec),
            compiler_params=pltpu.CompilerParams(
                dimension_semantics=red_semantics,
                vmem_limit_bytes=_VMEM_LIMIT_BYTES),
        )(jnp.reshape(inv_s_i, (1,)).astype(jnp.float32), x2)
        m = float(N * H * W)
        ch_sum_q = sump.sum(axis=(0, 2)).reshape(N, C).sum(axis=0)
        ch_sq_q = sqp.sum(axis=(0, 2)).reshape(N, C).sum(axis=0)
        mean = s_i * (ch_sum_q / m)
        ex2 = (s_i * s_i) * (ch_sq_q / m)
        var = jnp.maximum(ex2 - mean * mean, 0.0)  # biased var (BN training mode)
    else:
        mean = running_mean.astype(jnp.float32)
        var = running_var.astype(jnp.float32)

    # Per-channel affine: y = a_c * x_fq + b_c
    a = gamma / jnp.sqrt(var + eps)
    b = beta - a * mean

    # ---- qo scale: global min/max of y derived analytically (fq is monotone) ----
    ch_min = row_min.reshape(N, C).min(axis=0)
    ch_max = row_max.reshape(N, C).max(axis=0)
    ch_fq_min = s_i * jnp.round(jnp.clip(ch_min * inv_s_i, -QMAX, QMAX))
    ch_fq_max = s_i * jnp.round(jnp.clip(ch_max * inv_s_i, -QMAX, QMAX))
    y_hi = jnp.where(a >= 0, a * ch_fq_max, a * ch_fq_min) + b
    y_lo = jnp.where(a >= 0, a * ch_fq_min, a * ch_fq_max) + b
    ymax = jnp.maximum(jnp.max(y_hi), 0.0)
    ymin = jnp.minimum(jnp.min(y_lo), 0.0)
    s_o = jnp.maximum(jnp.abs(ymax), jnp.abs(ymin)) / QMAX
    s_o = jnp.where(s_o == 0.0, 1.0, s_o)
    inv_s_o = 1.0 / s_o

    # Fold the whole scale chain into the per-row affine: y/s_o = a2*q + b2.
    a2_rows = jnp.tile(a * (s_i * inv_s_o), N).reshape(R, 1).astype(jnp.float32)
    b2_rows = jnp.tile(b * inv_s_o, N).reshape(R, 1).astype(jnp.float32)
    scal = jnp.stack([inv_s_i, s_o]).astype(jnp.float32)

    # ---- K3: fused elementwise output pass ----
    out2 = pl.pallas_call(
        _out_kernel,
        out_shape=jax.ShapeDtypeStruct((R, L), x.dtype),
        grid=(Rb, Ct),
        in_specs=[pl.BlockSpec(memory_space=pltpu.MemorySpace.SMEM),
                  pl.BlockSpec((tr, 1), lambda i, j: (i, 0)),
                  pl.BlockSpec((tr, 1), lambda i, j: (i, 0)),
                  pl.BlockSpec((tr, tl), lambda i, j: (i, j))],
        out_specs=pl.BlockSpec((tr, tl), lambda i, j: (i, j)),
        compiler_params=pltpu.CompilerParams(
            dimension_semantics=("parallel", "parallel"),
            vmem_limit_bytes=_VMEM_LIMIT_BYTES),
    )(scal, a2_rows, b2_rows, x2)

    return out2.reshape(N, C, H, W)


# ---------------- pure-JAX reference (mirrors the PyTorch forward) ----------------

def _reference(x, gamma, beta, eps):
    def upd_scale(t):
        mx = jnp.maximum(jnp.max(t), 0.0)
        mn = jnp.minimum(jnp.min(t), 0.0)
        s = jnp.maximum(jnp.abs(mx), jnp.abs(mn)) / QMAX
        return jnp.where(s == 0.0, 1.0, s)

    def fq(t, s):
        return s * jnp.round(jnp.clip(t * (1.0 / s), -QMAX, QMAX))

    s_i = upd_scale(x)
    xfq = fq(x, s_i)
    mean = jnp.mean(xfq, axis=(0, 2, 3))
    # biased batch variance (mathematically identical to torch's mean((x-mean)^2))
    var = jnp.maximum(jnp.mean(xfq * xfq, axis=(0, 2, 3)) - mean * mean, 0.0)
    a = gamma / jnp.sqrt(var + eps)
    b = beta - a * mean
    y = a[None, :, None, None] * xfq + b[None, :, None, None]
    s_o = upd_scale(y)
    return fq(y, s_o)


if __name__ == "__main__":
    key = jax.random.PRNGKey(0)
    kx, kg, kb = jax.random.split(key, 3)
    N, C, H, W = 2, 4, 16, 16          # NCHW, conv-style activation
    x = jax.random.normal(kx, (N, C, H, W), jnp.float32)
    gamma = 1.0 + 0.1 * jax.random.normal(kg, (C,), jnp.float32)
    gamma = gamma.at[1].set(-0.7)      # exercise the negative-gamma branch
    beta = 0.1 * jax.random.normal(kb, (C,), jnp.float32)

    qbn = jax.jit(lambda xx, g, bb: qbn_forward(xx, g, bb, eps=1e-5))
    out = qbn(x, gamma, beta)
    out = jax.block_until_ready(out)

    ref = _reference(x, gamma, beta, 1e-5)
    assert out.shape == x.shape

    diff = jnp.abs(out - ref)
    # Robust check: at most a couple of one-quantization-step (< 0.05) disagreements are
    # tolerated, which can only come from float reduction/fold-order differences landing
    # on an exact round-half boundary; anything systematic would trip both assertions.
    assert float(jnp.max(diff)) < 5e-2, f"max diff {float(jnp.max(diff))}"
    assert int(jnp.sum(diff > 1e-4)) <= 2, f"mismatches {int(jnp.sum(diff > 1e-4))}"

    print("KERNEL_OK")
</pallas_src>

<mosaic_0001>
module attributes {stable_mosaic.version = 11 : i64} {
  func.func @_minmax_kernel(%arg0: i32, %arg1: i32, %arg2: i32, %arg3: memref<8x256xf32, #tpu.memory_space<vmem>>, %arg4: memref<1x8x128xf32, #tpu.memory_space<vmem>>, %arg5: memref<1x8x128xf32, #tpu.memory_space<vmem>>) attributes {dimension_semantics = [#tpu.dimension_semantics<parallel>, #tpu.dimension_semantics<parallel>, #tpu.dimension_semantics<arbitrary>], iteration_bounds = array<i64: 1, 1, 1>, scalar_prefetch = 0 : i64, scratch_operands = 0 : i64, tpu.core_type = #tpu.core_type<tc>, window_params = [{transform_indices = @transform_0, window_bounds = array<i64: 8, 256>}, {transform_indices = @transform_1, window_bounds = array<i64: 1, 8, 128>}, {transform_indices = @transform_2, window_bounds = array<i64: 1, 8, 128>}]} {
    %c0_i32 = arith.constant 0 : i32
    %0 = arith.cmpi eq, %arg2, %c0_i32 : i32
    %1 = arith.extui %0 : i1 to i32
    %c0_i32_0 = arith.constant 0 : i32
    %2 = arith.cmpi ne, %1, %c0_i32_0 : i32
    scf.if %2 {
      %cst = arith.constant 0x7F800000 : f32
      %22 = vector.broadcast %cst : f32 to vector<8x128xf32>
      %c0_14 = arith.constant 0 : index
      %c0_15 = arith.constant 0 : index
      %c0_16 = arith.constant 0 : index
      %23 = vector.load %arg4[%c0_14, %c0_15, %c0_16] : memref<1x8x128xf32, #tpu.memory_space<vmem>>, vector<1x8x128xf32>
      %24 = vector.shape_cast %23 : vector<1x8x128xf32> to vector<8x128xf32>
      %25 = vector.shape_cast %22 : vector<8x128xf32> to vector<1x8x128xf32>
      tpu.vector_store %arg4[%c0_14, %c0_15, %c0_16], %25 {strides = array<i32>} : memref<1x8x128xf32, #tpu.memory_space<vmem>>, vector<1x8x128xf32>,
      %cst_17 = arith.constant 0xFF800000 : f32
      %26 = vector.broadcast %cst_17 : f32 to vector<8x128xf32>
      %c0_18 = arith.constant 0 : index
      %c0_19 = arith.constant 0 : index
      %c0_20 = arith.constant 0 : index
      %27 = vector.load %arg5[%c0_18, %c0_19, %c0_20] : memref<1x8x128xf32, #tpu.memory_space<vmem>>, vector<1x8x128xf32>
      %28 = vector.shape_cast %27 : vector<1x8x128xf32> to vector<8x128xf32>
      %29 = vector.shape_cast %26 : vector<8x128xf32> to vector<1x8x128xf32>
      tpu.vector_store %arg5[%c0_18, %c0_19, %c0_20], %29 {strides = array<i32>} : memref<1x8x128xf32, #tpu.memory_space<vmem>>, vector<1x8x128xf32>,
    } else {
    }
    %c0 = arith.constant 0 : index
    %c0_1 = arith.constant 0 : index
    %3 = vector.load %arg3[%c0, %c0_1] : memref<8x256xf32, #tpu.memory_space<vmem>>, vector<8x256xf32>
    %4 = vector.extract_strided_slice %3 {offsets = [0, 0], sizes = [8, 128], strides = [1, 1]} : vector<8x256xf32> to vector<8x128xf32>
    %5 = vector.extract_strided_slice %3 {offsets = [0, 0], sizes = [8, 128], strides = [1, 1]} : vector<8x256xf32> to vector<8x128xf32>
    %6 = vector.extract_strided_slice %3 {offsets = [0, 128], sizes = [8, 128], strides = [1, 1]} : vector<8x256xf32> to vector<8x128xf32>
    %7 = arith.minimumf %4, %6 : vector<8x128xf32>
    %8 = vector.extract_strided_slice %3 {offsets = [0, 128], sizes = [8, 128], strides = [1, 1]} : vector<8x256xf32> to vector<8x128xf32>
    %9 = arith.maximumf %5, %8 : vector<8x128xf32>
    %c0_2 = arith.constant 0 : index
    %c0_3 = arith.constant 0 : index
    %c0_4 = arith.constant 0 : index
    %10 = vector.load %arg4[%c0_2, %c0_3, %c0_4] : memref<1x8x128xf32, #tpu.memory_space<vmem>>, vector<1x8x128xf32>
    %11 = vector.shape_cast %10 : vector<1x8x128xf32> to vector<8x128xf32>
    %12 = arith.minimumf %11, %7 : vector<8x128xf32>
    %c0_5 = arith.constant 0 : index
    %c0_6 = arith.constant 0 : index
    %c0_7 = arith.constant 0 : index
    %13 = vector.load %arg4[%c0_5, %c0_6, %c0_7] : memref<1x8x128xf32, #tpu.memory_space<vmem>>, vector<1x8x128xf32>
    %14 = vector.shape_cast %13 : vector<1x8x128xf32> to vector<8x128xf32>
    %15 = vector.shape_cast %12 : vector<8x128xf32> to vector<1x8x128xf32>
    tpu.vector_store %arg4[%c0_5, %c0_6, %c0_7], %15 {strides = array<i32>} : memref<1x8x128xf32, #tpu.memory_space<vmem>>, vector<1x8x128xf32>,
    %c0_8 = arith.constant 0 : index
    %c0_9 = arith.constant 0 : index
    %c0_10 = arith.constant 0 : index
    %16 = vector.load %arg5[%c0_8, %c0_9, %c0_10] : memref<1x8x128xf32, #tpu.memory_space<vmem>>, vector<1x8x128xf32>
    %17 = vector.shape_cast %16 : vector<1x8x128xf32> to vector<8x128xf32>
    %18 = arith.maximumf %17, %9 : vector<8x128xf32>
    %c0_11 = arith.constant 0 : index
    %c0_12 = arith.constant 0 : index
    %c0_13 = arith.constant 0 : index
    %19 = vector.load %arg5[%c0_11, %c0_12, %c0_13] : memref<1x8x128xf32, #tpu.memory_space<vmem>>, vector<1x8x128xf32>
    %20 = vector.shape_cast %19 : vector<1x8x128xf32> to vector<8x128xf32>
    %21 = vector.shape_cast %18 : vector<8x128xf32> to vector<1x8x128xf32>
    tpu.vector_store %arg5[%c0_11, %c0_12, %c0_13], %21 {strides = array<i32>} : memref<1x8x128xf32, #tpu.memory_space<vmem>>, vector<1x8x128xf32>,
    return
  }
  func.func @transform_0(%arg0: i32, %arg1: i32, %arg2: i32) -> (i32, i32) {
    %c1_i32 = arith.constant 1 : i32
    %0 = arith.muli %arg1, %c1_i32 : i32
    %1 = arith.addi %0, %arg2 : i32
    %c0_i32 = arith.constant 0 : i32
    return %arg0, %1 : i32, i32
  }
  func.func @transform_1(%arg0: i32, %arg1: i32, %arg2: i32) -> (i32, i32, i32) {
    %c0_i32 = arith.constant 0 : i32
    %c0_i32_0 = arith.constant 0 : i32
    return %arg1, %arg0, %c0_i32 : i32, i32, i32
  }
  func.func @transform_2(%arg0: i32, %arg1: i32, %arg2: i32) -> (i32, i32, i32) {
    %c0_i32 = arith.constant 0 : i32
    %c0_i32_0 = arith.constant 0 : i32
    return %arg1, %arg0, %c0_i32 : i32, i32, i32
  }
}

module attributes {stable_mosaic.version = 11 : i64} {
  func.func @_moments_kernel(%arg0: i32, %arg1: i32, %arg2: i32, %arg3: memref<1xf32, #tpu.memory_space<smem>>, %arg4: memref<8x256xf32, #tpu.memory_space<vmem>>, %arg5: memref<1x8x128xf32, #tpu.memory_space<vmem>>, %arg6: memref<1x8x128xf32, #tpu.memory_space<vmem>>) attributes {dimension_semantics = [#tpu.dimension_semantics<parallel>, #tpu.dimension_semantics<parallel>, #tpu.dimension_semantics<arbitrary>], iteration_bounds = array<i64: 1, 1, 1>, scalar_prefetch = 0 : i64, scratch_operands = 0 : i64, tpu.core_type = #tpu.core_type<tc>, window_params = [{transform_indices = @transform_0, window_bounds = array<i64: 1>}, {transform_indices = @transform_1, window_bounds = array<i64: 8, 256>}, {transform_indices = @transform_2, window_bounds = array<i64: 1, 8, 128>}, {transform_indices = @transform_3, window_bounds = array<i64: 1, 8, 128>}]} {
    %c0_i32 = arith.constant 0 : i32
    %0 = arith.cmpi eq, %arg2, %c0_i32 : i32
    %1 = arith.extui %0 : i1 to i32
    %c0_i32_0 = arith.constant 0 : i32
    %2 = arith.cmpi ne, %1, %c0_i32_0 : i32
    scf.if %2 {
      %cst_16 = arith.constant 0.000000e+00 : f32
      %30 = vector.broadcast %cst_16 : f32 to vector<8x128xf32>
      %c0_17 = arith.constant 0 : index
      %c0_18 = arith.constant 0 : index
      %c0_19 = arith.constant 0 : index
      %31 = vector.load %arg5[%c0_17, %c0_18, %c0_19] : memref<1x8x128xf32, #tpu.memory_space<vmem>>, vector<1x8x128xf32>
      %32 = vector.shape_cast %31 : vector<1x8x128xf32> to vector<8x128xf32>
      %33 = vector.shape_cast %30 : vector<8x128xf32> to vector<1x8x128xf32>
      tpu.vector_store %arg5[%c0_17, %c0_18, %c0_19], %33 {strides = array<i32>} : memref<1x8x128xf32, #tpu.memory_space<vmem>>, vector<1x8x128xf32>,
      %cst_20 = arith.constant 0.000000e+00 : f32
      %34 = vector.broadcast %cst_20 : f32 to vector<8x128xf32>
      %c0_21 = arith.constant 0 : index
      %c0_22 = arith.constant 0 : index
      %c0_23 = arith.constant 0 : index
      %35 = vector.load %arg6[%c0_21, %c0_22, %c0_23] : memref<1x8x128xf32, #tpu.memory_space<vmem>>, vector<1x8x128xf32>
      %36 = vector.shape_cast %35 : vector<1x8x128xf32> to vector<8x128xf32>
      %37 = vector.shape_cast %34 : vector<8x128xf32> to vector<1x8x128xf32>
      tpu.vector_store %arg6[%c0_21, %c0_22, %c0_23], %37 {strides = array<i32>} : memref<1x8x128xf32, #tpu.memory_space<vmem>>, vector<1x8x128xf32>,
    } else {
    }
    %c0 = arith.constant 0 : index
    %3 = memref.load %arg3[%c0] : memref<1xf32, #tpu.memory_space<smem>>
    %c0_1 = arith.constant 0 : index
    %c0_2 = arith.constant 0 : index
    %4 = vector.load %arg4[%c0_1, %c0_2] : memref<8x256xf32, #tpu.memory_space<vmem>>, vector<8x256xf32>
    %5 = vector.broadcast %3 : f32 to vector<8x256xf32>
    %6 = arith.mulf %4, %5 : vector<8x256xf32>
    %cst = arith.constant -1.270000e+02 : f32
    %cst_3 = arith.constant 1.270000e+02 : f32
    %7 = vector.broadcast %cst : f32 to vector<8x256xf32>
    %8 = arith.maximumf %7, %6 : vector<8x256xf32>
    %9 = vector.broadcast %cst_3 : f32 to vector<8x256xf32>
    %10 = arith.minimumf %9, %8 : vector<8x256xf32>
    %11 = math.roundeven %10 : vector<8x256xf32>
    %12 = vector.extract_strided_slice %11 {offsets = [0, 0], sizes = [8, 128], strides = [1, 1]} : vector<8x256xf32> to vector<8x128xf32>
    %13 = arith.mulf %12, %12 : vector<8x128xf32>
    %14 = vector.extract_strided_slice %11 {offsets = [0, 128], sizes = [8, 128], strides = [1, 1]} : vector<8x256xf32> to vector<8x128xf32>
    %15 = arith.addf %12, %14 : vector<8x128xf32>
    %16 = arith.mulf %14, %14 : vector<8x128xf32>
    %17 = arith.addf %13, %16 : vector<8x128xf32>
    %c0_4 = arith.constant 0 : index
    %c0_5 = arith.constant 0 : index
    %c0_6 = arith.constant 0 : index
    %18 = vector.load %arg5[%c0_4, %c0_5, %c0_6] : memref<1x8x128xf32, #tpu.memory_space<vmem>>, vector<1x8x128xf32>
    %19 = vector.shape_cast %18 : vector<1x8x128xf32> to vector<8x128xf32>
    %20 = arith.addf %19, %15 : vector<8x128xf32>
    %c0_7 = arith.constant 0 : index
    %c0_8 = arith.constant 0 : index
    %c0_9 = arith.constant 0 : index
    %21 = vector.load %arg5[%c0_7, %c0_8, %c0_9] : memref<1x8x128xf32, #tpu.memory_space<vmem>>, vector<1x8x128xf32>
    %22 = vector.shape_cast %21 : vector<1x8x128xf32> to vector<8x128xf32>
    %23 = vector.shape_cast %20 : vector<8x128xf32> to vector<1x8x128xf32>
    tpu.vector_store %arg5[%c0_7, %c0_8, %c0_9], %23 {strides = array<i32>} : memref<1x8x128xf32, #tpu.memory_space<vmem>>, vector<1x8x128xf32>,
    %c0_10 = arith.constant 0 : index
    %c0_11 = arith.constant 0 : index
    %c0_12 = arith.constant 0 : index
    %24 = vector.load %arg6[%c0_10, %c0_11, %c0_12] : memref<1x8x128xf32, #tpu.memory_space<vmem>>, vector<1x8x128xf32>
    %25 = vector.shape_cast %24 : vector<1x8x128xf32> to vector<8x128xf32>
    %26 = arith.addf %25, %17 : vector<8x128xf32>
    %c0_13 = arith.constant 0 : index
    %c0_14 = arith.constant 0 : index
    %c0_15 = arith.constant 0 : index
    %27 = vector.load %arg6[%c0_13, %c0_14, %c0_15] : memref<1x8x128xf32, #tpu.memory_space<vmem>>, vector<1x8x128xf32>
    %28 = vector.shape_cast %27 : vector<1x8x128xf32> to vector<8x128xf32>
    %29 = vector.shape_cast %26 : vector<8x128xf32> to vector<1x8x128xf32>
    tpu.vector_store %arg6[%c0_13, %c0_14, %c0_15], %29 {strides = array<i32>} : memref<1x8x128xf32, #tpu.memory_space<vmem>>, vector<1x8x128xf32>,
    return
  }
  func.func @transform_0(%arg0: i32, %arg1: i32, %arg2: i32) -> i32 {
    %c0_i32 = arith.constant 0 : i32
    %c0_i32_0 = arith.constant 0 : i32
    return %c0_i32 : i32
  }
  func.func @transform_1(%arg0: i32, %arg1: i32, %arg2: i32) -> (i32, i32) {
    %c1_i32 = arith.constant 1 : i32
    %0 = arith.muli %arg1, %c1_i32 : i32
    %1 = arith.addi %0, %arg2 : i32
    %c0_i32 = arith.constant 0 : i32
    return %arg0, %1 : i32, i32
  }
  func.func @transform_2(%arg0: i32, %arg1: i32, %arg2: i32) -> (i32, i32, i32) {
    %c0_i32 = arith.constant 0 : i32
    %c0_i32_0 = arith.constant 0 : i32
    return %arg1, %arg0, %c0_i32 : i32, i32, i32
  }
  func.func @transform_3(%arg0: i32, %arg1: i32, %arg2: i32) -> (i32, i32, i32) {
    %c0_i32 = arith.constant 0 : i32
    %c0_i32_0 = arith.constant 0 : i32
    return %arg1, %arg0, %c0_i32 : i32, i32, i32
  }
}

module attributes {stable_mosaic.version = 11 : i64} {
  func.func @_out_kernel(%arg0: i32, %arg1: i32, %arg2: memref<2xf32, #tpu.memory_space<smem>>, %arg3: memref<8x1xf32, #tpu.memory_space<vmem>>, %arg4: memref<8x1xf32, #tpu.memory_space<vmem>>, %arg5: memref<8x256xf32, #tpu.memory_space<vmem>>, %arg6: memref<8x256xf32, #tpu.memory_space<vmem>>) attributes {dimension_semantics = [#tpu.dimension_semantics<parallel>, #tpu.dimension_semantics<parallel>], iteration_bounds = array<i64: 1, 1>, scalar_prefetch = 0 : i64, scratch_operands = 0 : i64, tpu.core_type = #tpu.core_type<tc>, window_params = [{transform_indices = @transform_0, window_bounds = array<i64: 2>}, {transform_indices = @transform_1, window_bounds = array<i64: 8, 1>}, {transform_indices = @transform_2, window_bounds = array<i64: 8, 1>}, {transform_indices = @transform_3, window_bounds = array<i64: 8, 256>}, {transform_indices = @transform_4, window_bounds = array<i64: 8, 256>}]} {
    %c0 = arith.constant 0 : index
    %0 = memref.load %arg2[%c0] : memref<2xf32, #tpu.memory_space<smem>>
    %c1 = arith.constant 1 : index
    %1 = memref.load %arg2[%c1] : memref<2xf32, #tpu.memory_space<smem>>
    %c0_0 = arith.constant 0 : index
    %c0_1 = arith.constant 0 : index
    %2 = vector.load %arg5[%c0_0, %c0_1] : memref<8x256xf32, #tpu.memory_space<vmem>>, vector<8x256xf32>
    %3 = vector.broadcast %0 : f32 to vector<8x256xf32>
    %4 = arith.mulf %2, %3 : vector<8x256xf32>
    %cst = arith.constant -1.270000e+02 : f32
    %cst_2 = arith.constant 1.270000e+02 : f32
    %5 = vector.broadcast %cst : f32 to vector<8x256xf32>
    %6 = arith.maximumf %5, %4 : vector<8x256xf32>
    %7 = vector.broadcast %cst_2 : f32 to vector<8x256xf32>
    %8 = arith.minimumf %7, %6 : vector<8x256xf32>
    %9 = math.roundeven %8 : vector<8x256xf32>
    %c0_3 = arith.constant 0 : index
    %c0_4 = arith.constant 0 : index
    %10 = vector.load %arg3[%c0_3, %c0_4] : memref<8x1xf32, #tpu.memory_space<vmem>>, vector<8x1xf32>
    %11 = vector.broadcast %10 : vector<8x1xf32> to vector<8x256xf32>
    %12 = arith.mulf %11, %9 : vector<8x256xf32>
    %c0_5 = arith.constant 0 : index
    %c0_6 = arith.constant 0 : index
    %13 = vector.load %arg4[%c0_5, %c0_6] : memref<8x1xf32, #tpu.memory_space<vmem>>, vector<8x1xf32>
    %14 = vector.broadcast %13 : vector<8x1xf32> to vector<8x256xf32>
    %15 = arith.addf %12, %14 : vector<8x256xf32>
    %cst_7 = arith.constant -1.270000e+02 : f32
    %cst_8 = arith.constant 1.270000e+02 : f32
    %16 = vector.broadcast %cst_7 : f32 to vector<8x256xf32>
    %17 = arith.maximumf %16, %15 : vector<8x256xf32>
    %18 = vector.broadcast %cst_8 : f32 to vector<8x256xf32>
    %19 = arith.minimumf %18, %17 : vector<8x256xf32>
    %20 = math.roundeven %19 : vector<8x256xf32>
    %21 = vector.broadcast %1 : f32 to vector<8x256xf32>
    %22 = arith.mulf %21, %20 : vector<8x256xf32>
    %c0_9 = arith.constant 0 : index
    %c0_10 = arith.constant 0 : index
    %23 = vector.load %arg6[%c0_9, %c0_10] : memref<8x256xf32, #tpu.memory_space<vmem>>, vector<8x256xf32>
    tpu.vector_store %arg6[%c0_9, %c0_10], %22 {strides = array<i32>} : memref<8x256xf32, #tpu.memory_space<vmem>>, vector<8x256xf32>,
    return
  }
  func.func @transform_0(%arg0: i32, %arg1: i32) -> i32 {
    %c0_i32 = arith.constant 0 : i32
    %c0_i32_0 = arith.constant 0 : i32
    return %c0_i32 : i32
  }
  func.func @transform_1(%arg0: i32, %arg1: i32) -> (i32, i32) {
    %c0_i32 = arith.constant 0 : i32
    %c0_i32_0 = arith.constant 0 : i32
    return %arg0, %c0_i32 : i32, i32
  }
  func.func @transform_2(%arg0: i32, %arg1: i32) -> (i32, i32) {
    %c0_i32 = arith.constant 0 : i32
    %c0_i32_0 = arith.constant 0 : i32
    return %arg0, %c0_i32 : i32, i32
  }
  func.func @transform_3(%arg0: i32, %arg1: i32) -> (i32, i32) {
    %c0_i32 = arith.constant 0 : i32
    return %arg0, %arg1 : i32, i32
  }
  func.func @transform_4(%arg0: i32, %arg1: i32) -> (i32, i32) {
    %c0_i32 = arith.constant 0 : i32
    return %arg0, %arg1 : i32, i32
  }
}

</mosaic_0001>

<bundles_post_ra>
// kernel: tile.13
= control target key start
LH: loop header
LB: loop body
LE: loop exit
PB: predicated region body
PF: predicated region fallthrough
CT: control target
= control target key end

     0   :  { %s22_s0 = inlined_call_operand.vmem [shape: f32[4], index: 0, kind: input, shape index: {}]   ;;  %s23_s1 = inlined_call_operand.vmem [shape: f32[2,4], index: 1, kind: output, shape index: {}]  }
   0x1   :  { %v4_v0 = vld [vmem:[%s22_s0] ss:$0 sm:$0xff] }
   0x2   :  { %5 = vst [vmem:[%s23_s1] sm:$0x3] %v4_v0 }

// kernel: tile.1
= control target key start
LH: loop header
LB: loop body
LE: loop exit
PB: predicated region body
PF: predicated region fallthrough
CT: control target
= control target key end

     0   :  { %s34_s8 = smov 125   ;;  %vm7_vm0 = vcmask 7168   ;;  %s35_s11 = smov 126   ;;  %s61_s0 = inlined_call_operand.vmem [shape: f32[2,4], index: 0, kind: input, shape index: {}]   ;;  %s62_s1 = inlined_call_operand.vmem [shape: f32[8,1], index: 1, kind: output, shape index: {}]  }
   0x1   :  { %v4_v0 = vld [vmem:[%s61_s0] sm:$0x3]  ;;  %s33_s0 = smov 127  }
   0x2   :  { %5 = vst [vmem:[#allocation0] sm:$0x3] %v4_v0 }
   0x9   :  { %v9_v1 = vld [vmem:[#allocation0] sm:$0x3]  }
   0xa   :  { %v21_v2 = vld [vmem:[#allocation0] sm:$0x3]   ;;  %10 = vrot.lane.b32.xlu0 %v9_v1, %s33_s0 }
   0xb   :  { %22 = vrot.lane.b32.xlu1 %v21_v2, %s34_s8  ;;  %v6_v3 = vld [vmem:[#allocation0] sm:$0x3]  }
   0xc   :  { %v15_v4 = vld [vmem:[#allocation0] sm:$0x3]   ;;  %8 = vst.msk [vmem:[%s62_s1] ss:$4 sm:$0x3] %vm7_vm0, %v6_v3  }
   0xe   :  { %16 = vrot.lane.b32.xlu0 %v15_v4, %s35_s11 }
  0x7c   :  { %v11_v5 = vpop.permute.xlu0 %10  }
  0x7d   :  { %v23_v6 = vpop.permute.xlu1 %22   ;;  %27 = vst.msk [vmem:[%s62_s1 + $0x1] ss:$4 sm:$0x3] %vm7_vm0, %v11_v5  }
  0x7e   :  { %29 = vst.msk [vmem:[%s62_s1 + $0x3] ss:$4 sm:$0x3] %vm7_vm0, %v23_v6  }
  0x80   :  { %v17_v7 = vpop.permute.xlu0 %16  }
  0x81   :  { %28 = vst.msk [vmem:[%s62_s1 + $0x2] ss:$4 sm:$0x3] %vm7_vm0, %v17_v7  }

// kernel: _lambda_.3
= control target key start
LH: loop header
LB: loop body
LE: loop exit
PB: predicated region body
PF: predicated region fallthrough
CT: control target
= control target key end

     0   :  { %s91_s0 = inlined_call_operand.vmem [shape: f32[8,256], index: 0, kind: input, shape index: {}]   ;;  %s92_s1 = inlined_call_operand.vmem [shape: f32[1,8,128], index: 1, kind: output, shape index: {0}]   ;;  %s93_s2 = inlined_call_operand.vmem [shape: f32[1,8,128], index: 2, kind: output, shape index: {1}]  }
   0x1   :  { %v38_v0 = vld [vmem:[%s91_s0] sm:$0xff]  ;;  %v39_v1 = vld [vmem:[%s91_s0 + $0x8] sm:$0xff] }
   0x2   :  { %v40_v2 = vmin.f32 %v38_v0, %v39_v1  ;;  %v41_v3 = vmax.f32 %v38_v0, %v39_v1 }
   0x4   :  { %44 = vst [vmem:[%s92_s1] sm:$0xff] %v40_v2  ;;  %47 = vst [vmem:[%s93_s2] sm:$0xff] %v41_v3 }

// kernel: _lambda_.4
= control target key start
LH: loop header
LB: loop body
LE: loop exit
PB: predicated region body
PF: predicated region fallthrough
CT: control target
= control target key end

     0   :  { %s118_s0 = inlined_call_operand.<no memory space> [shape: f32[1], index: 0, kind: input, shape index: {}]   ;;  %s119_s1 = inlined_call_operand.vmem [shape: f32[8,256], index: 1, kind: input, shape index: {}]   ;;  %s120_s2 = inlined_call_operand.vmem [shape: f32[1,8,128], index: 2, kind: output, shape index: {0}]   ;;  %s121_s3 = inlined_call_operand.vmem [shape: f32[1,8,128], index: 3, kind: output, shape index: {1}]  }
   0x1   :  { %v43_v0 = vld [vmem:[%s119_s1] sm:$0xff]  ;;  %v44_v1 = vld [vmem:[%s119_s1 + $0x8] sm:$0xff]  ;;  %v45_v2 = vstv %s118_s0 }
   0x2   :  { %v46_v3 = vmul.f32 %v45_v2, %v43_v0  ;;  %v47_v4 = vmul.f32 %v45_v2, %v44_v1 }
   0x4   :  { %v78_v5 = vclamps-f32 %v46_v3, 127.0  ;;  %v79_v6 = vclamps-f32 %v47_v4, 127.0 }
   0x6   :  { %v80_v7 = vround.rtne.f32 %v78_v5  ;;  %v81_v8 = vround.rtne.f32 %v79_v6 }
   0x8   :  { %v55_v9 = vadd.f32 %v81_v8, %v80_v7  ;;  %v54_v10 = vmul.f32 %v80_v7, %v80_v7  ;;  %v56_v11 = vmul.f32 %v81_v8, %v81_v8 }
   0xa   :  { %v57_v12 = vadd.f32 %v56_v11, %v54_v10  ;;  %60 = vst [vmem:[%s120_s2] sm:$0xff] %v55_v9 }
   0xc   :  { %63 = vst [vmem:[%s121_s3] sm:$0xff] %v57_v12 }

// kernel: _lambda_.5
= control target key start
LH: loop header
LB: loop body
LE: loop exit
PB: predicated region body
PF: predicated region fallthrough
CT: control target
= control target key end

     0   :  { %9 = vsyncpa [#allocation3], 0  ;;  %s149_s0 = inlined_call_operand.vmem [shape: f32[2], index: 0, kind: input, shape index: {}]   ;;  %s150_s1 = inlined_call_operand.vmem [shape: f32[8,1], index: 1, kind: input, shape index: {}]   ;;  %s151_s2 = inlined_call_operand.vmem [shape: f32[8,1], index: 2, kind: input, shape index: {}]   ;;  %s152_s3 = inlined_call_operand.vmem [shape: f32[8,256], index: 3, kind: input, shape index: {}]   ;;  %s153_s4 = inlined_call_operand.vmem [shape: f32[8,256], index: 4, kind: output, shape index: {}]  }
   0x1   :  { %s16_s17 = sshll.u32 %s149_s0, 4  ;;  %s17_s17 = int_to_ptr.vmem [resolvable:$true] %s16_s17 }
   0x2   :  { %s87_s18 = scalar_lea.vmem %s17_s17, 16  ;;  %p92_p1 = scmp.lt.s32.totalorder %s17_s17, %s17_s17 }
   0x3   :  { %p88_p0 = scmp.ne.s32.totalorder %s17_s17, %s87_s18  ;;  %p93_p2 = scmp.lt.s32.totalorder %s87_s18, %s87_s18 }
   0x5   :  { %p94_p3 = por %p93_p2, %p92_p1 }
   0x7   :  { %p95_p4 = pnand %p94_p3, %p88_p0 }
   0x9   :  { %98 = shalt.err (!%p95_p4)
}
   0xa   :  { %s101_s19 = smov [#allocation2]  }
   0xb   :  { %19 = dma.vmem_to_smem %s17_s17, 16, %s101_s19, [#allocation3]  }
   0xc   :  { %99 = dma.done.wait [#allocation3], 16  }
   0xd   :  { %100 = vsyncadd [#allocation3], 4294967280 }
   0xe   :  { %29 = sfence }
   0xf   :  { %v43_v0 = vld [vmem:[%s150_s1] sm:$0xff]  ;;  %v102_v1 = vmov 0   ;;  %s30_s23 = sld [smem:[#allocation2]]  ;;  %v33_v4 = vld [vmem:[%s152_s3 + $0x8] sm:$0xff]  ;;  %s75_s1 = sld [smem:[#allocation2 + $0x1]] }
  0x10   :  { %86 = vset.pattern.permute.xlu0 %v102_v1  ;;  %v51_v2 = vld [vmem:[%s151_s2] sm:$0xff] }
  0x11   :  { %46 = vperm.xlu0 %86, %v43_v0   ;;  %v32_v3 = vld [vmem:[%s152_s3] sm:$0xff] }
  0x15   :  { %54 = vperm.xlu0 %86, %v51_v2   ;;  %v34_v5 = vstv %s30_s23  ;;  %v65_v20 = vstv %s75_s1 }
  0x16   :  { %v35_v6 = vmul.f32 %v34_v5, %v32_v3  ;;  %v36_v7 = vmul.f32 %v34_v5, %v33_v4 }
  0x18   :  { %v76_v8 = vclamps-f32 %v35_v6, 127.0  ;;  %v77_v9 = vclamps-f32 %v36_v7, 127.0 }
  0x1a   :  { %v80_v10 = vround.rtne.f32 %v76_v8  ;;  %v81_v11 = vround.rtne.f32 %v77_v9 }
  0x90   :  { %v47_v12 = vpop.permute.xlu0 %46 }
  0x91   :  { %v49_v13 = vmul.f32 %v80_v10, %v47_v12  ;;  %v50_v14 = vmul.f32 %v81_v11, %v47_v12 }
  0x94   :  { %v55_v15 = vpop.permute.xlu0 %54 }
  0x95   :  { %v57_v16 = vadd.f32 %v55_v15, %v49_v13  ;;  %v58_v17 = vadd.f32 %v55_v15, %v50_v14 }
  0x97   :  { %v78_v18 = vclamps-f32 %v57_v16, 127.0  ;;  %v79_v19 = vclamps-f32 %v58_v17, 127.0 }
  0x99   :  { %v82_v21 = vround.rtne.f32 %v78_v18  ;;  %v83_v22 = vround.rtne.f32 %v79_v19 }
  0x9b   :  { %v66_v23 = vmul.f32 %v82_v21, %v65_v20  ;;  %v67_v24 = vmul.f32 %v83_v22, %v65_v20 }
  0x9d   :  { %68 = vst [vmem:[%s153_s4] sm:$0xff] %v66_v23  ;;  %69 = vst [vmem:[%s153_s4 + $0x8] sm:$0xff] %v67_v24 }
  0x9e   :  { %74 = vsyncpa [#allocation3], 1 }

</bundles_post_ra>
